<compile_context>
chip_gen: v7x
topology: tpu7x:2x2x1
jax: 0.10.0
libtpu: 0.0.40
codegen_flags: <defaults>
</compile_context>

<pallas_src>
import jax
import jax.numpy as jnp
from jax.experimental import pallas as pl
from jax.experimental.pallas import tpu as pltpu


def _round_up(x, m):
    return ((x + m - 1) // m) * m


def _pad2(a, mp, np_):
    m, n = a.shape
    return jnp.pad(a, ((0, mp - m), (0, np_ - n)))


# ------------------------------------------------------------------
# Fused GCN layer:  out = A_hat @ (X @ W) + b   (single pallas_call)
# ------------------------------------------------------------------

def _gcn_kernel(a_ref, x_ref, w_ref, b_ref, o_ref, t_ref):
    t_ref[...] = jnp.dot(x_ref[...], w_ref[...],
                         preferred_element_type=jnp.float32)
    o_ref[...] = (jnp.dot(a_ref[...], t_ref[...],
                          preferred_element_type=jnp.float32) + b_ref[...])


def gcn_layer(a_hat, x, w, b):
    n = x.shape[0]
    fin, fout = w.shape
    npn = _round_up(max(n, 8), 8)          # node rows (output side)
    nk = _round_up(n, 128)                 # node contraction dim
    fin_p = _round_up(fin, 128)
    fout_p = _round_up(fout, 128)
    a_p = _pad2(a_hat.astype(jnp.float32), npn, nk)
    x_p = _pad2(x.astype(jnp.float32), nk, fin_p)
    w_p = _pad2(w.astype(jnp.float32), fin_p, fout_p)
    b_p = _pad2(b.reshape(1, -1).astype(jnp.float32), 1, fout_p)
    out = pl.pallas_call(
        _gcn_kernel,
        out_shape=jax.ShapeDtypeStruct((npn, fout_p), jnp.float32),
        grid_spec=pltpu.PrefetchScalarGridSpec(
            num_scalar_prefetch=0,
            grid=(1,),
            in_specs=[pl.BlockSpec((npn, nk), lambda i: (0, 0)),
                      pl.BlockSpec((nk, fin_p), lambda i: (0, 0)),
                      pl.BlockSpec((fin_p, fout_p), lambda i: (0, 0)),
                      pl.BlockSpec((1, fout_p), lambda i: (0, 0))],
            out_specs=pl.BlockSpec((npn, fout_p), lambda i: (0, 0)),
            scratch_shapes=[pltpu.VMEM((nk, fout_p), jnp.float32)],
        ),
        compiler_params=pltpu.CompilerParams(
            dimension_semantics=("arbitrary",)),
    )(a_p, x_p, w_p, b_p)
    return out[:n, :fout]


# ------------------------------------------------------------------
# Fused dense chain: h = x; repeat [h = (h @ W) * scale + shift; relu?]
# Single pallas_call, all weights resident in VMEM (bf16), f32 accumulation.
# ------------------------------------------------------------------

def _make_chain_kernel(relu_flags):
    n_layers = len(relu_flags)

    def kernel(*refs):
        x_ref = refs[0]
        o_ref = refs[-1]
        h = x_ref[...]
        for i in range(n_layers):
            w_ref = refs[1 + 3 * i]
            s_ref = refs[2 + 3 * i]
            t_ref = refs[3 + 3 * i]
            h = jnp.dot(h.astype(jnp.bfloat16), w_ref[...],
                        preferred_element_type=jnp.float32)
            h = h * s_ref[...] + t_ref[...]
            if relu_flags[i]:
                h = jnp.maximum(h, 0.0)
        o_ref[...] = h.astype(o_ref.dtype)

    return kernel


def mlp_chain(x, layers):
    """layers = [(w [K,N], scale [N], shift [N], relu: bool), ...]."""
    M, k0 = x.shape
    Mp = _round_up(max(M, 8), 8)
    dims = [k0] + [w.shape[1] for (w, _, _, _) in layers]
    dims_p = [_round_up(d, 128) for d in dims]
    relu_flags = tuple(bool(l[3]) for l in layers)

    args = [_pad2(x.astype(jnp.float32), Mp, dims_p[0]).astype(jnp.bfloat16)]
    in_specs = [pl.BlockSpec((Mp, dims_p[0]), lambda i: (0, 0))]
    for li, (w, scale, shift, _) in enumerate(layers):
        kp, np_ = dims_p[li], dims_p[li + 1]
        args.append(_pad2(w.astype(jnp.float32), kp, np_).astype(jnp.bfloat16))
        args.append(_pad2(scale.reshape(1, -1).astype(jnp.float32), 1, np_))
        args.append(_pad2(shift.reshape(1, -1).astype(jnp.float32), 1, np_))
        in_specs.append(pl.BlockSpec((kp, np_), lambda i: (0, 0)))
        in_specs.append(pl.BlockSpec((1, np_), lambda i: (0, 0)))
        in_specs.append(pl.BlockSpec((1, np_), lambda i: (0, 0)))

    out = pl.pallas_call(
        _make_chain_kernel(relu_flags),
        out_shape=jax.ShapeDtypeStruct((Mp, dims_p[-1]), jnp.float32),
        grid_spec=pltpu.PrefetchScalarGridSpec(
            num_scalar_prefetch=0,
            grid=(1,),
            in_specs=in_specs,
            out_specs=pl.BlockSpec((Mp, dims_p[-1]), lambda i: (0, 0)),
        ),
        compiler_params=pltpu.CompilerParams(
            dimension_semantics=("arbitrary",),
            vmem_limit_bytes=48 * 1024 * 1024),   # fc1_xt weights (~10 MB bf16) in VMEM
    )(*args)
    return out[:M, :dims[-1]]


# ------------------------------------------------------------------
# Fused Conv1d (valid padding, in-kernel tap accumulation) + BN + ReLU
# ------------------------------------------------------------------

def _conv_bn_relu_kernel(seq_ref, w_ref, s_ref, t_ref, o_ref):
    # seq_ref: (1, Lpad, Cin) f32 ; w_ref: (K, Cin, Cout) bf16
    # s_ref / t_ref: (1, Cout) f32 ; o_ref: (1, TM, Cout) f32
    tm = o_ref.shape[1]
    ksize = w_ref.shape[0]
    m0 = pl.multiple_of(pl.program_id(1) * tm, tm)
    acc = jnp.zeros((tm, o_ref.shape[2]), jnp.float32)
    for t in range(ksize):                 # static unroll over the 12 taps
        sl = seq_ref[0, pl.ds(m0 + t, tm), :].astype(jnp.bfloat16)
        acc = acc + jnp.dot(sl, w_ref[t], preferred_element_type=jnp.float32)
    o_ref[0] = jnp.maximum(acc * s_ref[...] + t_ref[...], 0.0)


def conv1d_bn_relu(seq, w, scale, shift, tm=256):
    """seq: (B, L, Cin) channels-last. w: (K, Cin, Cout) tap-major.

    Returns (B, ceil((L-K+1)/tm)*tm, Cout) f32; rows [0, L-K+1) are the valid
    conv outputs with the folded BatchNorm affine + ReLU already applied."""
    B, L, cin = seq.shape
    ksize, _, cout = w.shape
    lout = L - ksize + 1
    n_tiles = pl.cdiv(lout, tm)
    lpad = n_tiles * tm + ksize - 1
    seq_p = jnp.pad(seq.astype(jnp.float32), ((0, 0), (0, lpad - L), (0, 0)))
    out = pl.pallas_call(
        _conv_bn_relu_kernel,
        out_shape=jax.ShapeDtypeStruct((B, n_tiles * tm, cout), jnp.float32),
        grid_spec=pltpu.PrefetchScalarGridSpec(
            num_scalar_prefetch=0,
            grid=(B, n_tiles),
            in_specs=[
                pl.BlockSpec((1, lpad, cin), lambda b, m: (b, 0, 0)),
                pl.BlockSpec((ksize, cin, cout), lambda b, m: (0, 0, 0)),
                pl.BlockSpec((1, cout), lambda b, m: (0, 0)),
                pl.BlockSpec((1, cout), lambda b, m: (0, 0)),
            ],
            out_specs=pl.BlockSpec((1, tm, cout), lambda b, m: (b, m, 0)),
        ),
        compiler_params=pltpu.CompilerParams(
            dimension_semantics=("parallel", "arbitrary")),
    )(seq_p, w.astype(jnp.bfloat16),
      scale.reshape(1, -1).astype(jnp.float32),
      shift.reshape(1, -1).astype(jnp.float32))
    return out


# ------------------------------------------------------------------
# BatchNorm(eval) folding helpers
# ------------------------------------------------------------------

def _bn_fold(gamma, beta, running_mean, running_var, eps=1e-5):
    scale = gamma * jax.lax.rsqrt(running_var + eps)
    shift = beta - running_mean * scale
    return scale, shift


def _conv_affine(bias, bn):
    scale, shift = _bn_fold(*bn)
    return scale, bias * scale + shift


# ---------------------------- model forward ----------------------------

def cnnet_forward(params, x, edge_index, batch, num_graphs, target):
    # ----- graph (drug) branch -----
    n = x.shape[0]
    src, dst = edge_index[0], edge_index[1]
    A = jnp.zeros((n, n), jnp.float32).at[dst, src].set(1.0)
    A = A + jnp.eye(n, dtype=jnp.float32)                 # add self loops
    deg = A.sum(axis=1)
    dinv = jax.lax.rsqrt(deg)
    a_hat = dinv[:, None] * A * dinv[None, :]              # D^-1/2 (A+I) D^-1/2

    def gnorm_relu(h, p, eps=1e-5):
        # PyG GraphNorm (per-graph mean/var) + ReLU -- segment ops in JAX glue.
        gamma, beta, mean_scale = p
        cnt = jax.ops.segment_sum(jnp.ones((h.shape[0],), jnp.float32),
                                  batch, num_graphs)[:, None]
        mean = jax.ops.segment_sum(h, batch, num_graphs) / cnt
        out = h - mean[batch] * mean_scale
        var = jax.ops.segment_sum(out * out, batch, num_graphs) / cnt
        std = jnp.sqrt(var + eps)
        return jnp.maximum(gamma * (out / std[batch]) + beta, 0.0)

    h = gcn_layer(a_hat, x, params['gconv1_w'], params['gconv1_b'])
    h = gnorm_relu(h, params['gnorm1'])
    h = gcn_layer(a_hat, h, params['gconv2_w'], params['gconv2_b'])
    h = gnorm_relu(h, params['gnorm2'])
    h = gcn_layer(a_hat, h, params['gconv3_w'], params['gconv3_b'])
    h = gnorm_relu(h, params['gnorm3'])

    # global mean pool (segment mean, JAX glue)
    cnt = jax.ops.segment_sum(jnp.ones((h.shape[0],), jnp.float32),
                              batch, num_graphs)[:, None]
    hg = jax.ops.segment_sum(h, batch, num_graphs) / cnt    # (B, 276)

    # fused: fc_g1 -> bn1 -> relu -> [dropout=id] -> fc_g2 -> relu
    s1, t1 = _bn_fold(*params['bn1'])
    xg = mlp_chain(hg, [
        (params['fc_g1_w'], s1, params['fc_g1_b'] * s1 + t1, True),
        (params['fc_g2_w'], jnp.ones((128,), jnp.float32),
         params['fc_g2_b'], True),
    ])                                                       # (B, 128)

    # ----- protein (sequence) branch -----
    emb = params['embed'][target]                            # (B, L, 128)
    c1 = conv1d_bn_relu(emb, params['conv1_w'],
                        *_conv_affine(params['conv1_b'], params['xtbn1']))
    c2 = conv1d_bn_relu(c1, params['conv2_w'],
                        *_conv_affine(params['conv2_b'], params['xtbn2']))
    c3 = conv1d_bn_relu(c2, params['conv3_w'],
                        *_conv_affine(params['conv3_b'], params['xtbn3']))
    # c3: (B, 1024, 64); rows [0, 967) are the valid conv3 outputs.

    # MaxPool1d(kernel=12, stride=12) over length, then channel-major flatten
    # to match torch's .view(-1, 80*64) on an NCL tensor.
    B = c3.shape[0]
    pooled = c3[:, :80 * 12, :].reshape(B, 80, 12, -1).max(axis=2)   # (B,80,64)
    xt = jnp.transpose(pooled, (0, 2, 1)).reshape(B, 80 * 64)        # (B,5120)

    # fused: fc1_xt -> bn1t -> relu -> [dropout=id] -> fc2_xt -> relu
    s1t, t1t = _bn_fold(*params['bn1t'])
    xt = mlp_chain(xt, [
        (params['fc1_xt_w'], s1t, params['fc1_xt_b'] * s1t + t1t, True),
        (params['fc2_xt_w'], jnp.ones((128,), jnp.float32),
         params['fc2_xt_b'], True),
    ])                                                       # (B, 128)

    # ----- fusion head (single fused kernel) -----
    xc = jnp.concatenate([xg, xt], axis=1)                   # (B, 256)
    s2, t2 = _bn_fold(*params['bn2'])
    s3, t3 = _bn_fold(*params['bn3'])
    out = mlp_chain(xc, [
        (params['fc1_w'], s2, params['fc1_b'] * s2 + t2, True),
        (params['fc2_w'], s3, params['fc2_b'] * s3 + t3, True),
        (params['out_w'], jnp.ones((1,), jnp.float32), params['out_b'], False),
    ])                                                       # (B, 1)
    return out


# ---------------------------- parameter init ----------------------------

def init_params(key):
    keys = jax.random.split(key, 16)

    def w(k, shape, scale=0.05):
        return (scale * jax.random.normal(k, shape)).astype(jnp.float32)

    def zeros(n):
        return jnp.zeros((n,), jnp.float32)

    def ones(n):
        return jnp.ones((n,), jnp.float32)

    def bn(n):  # (gamma, beta, running_mean, running_var)
        return (ones(n), zeros(n), zeros(n), ones(n))

    nfd = 69         # num_features_xd
    return dict(
        gconv1_w=w(keys[0], (nfd, nfd)),         gconv1_b=zeros(nfd),
        gconv2_w=w(keys[1], (nfd, 2 * nfd)),     gconv2_b=zeros(2 * nfd),
        gconv3_w=w(keys[2], (2 * nfd, 4 * nfd)), gconv3_b=zeros(4 * nfd),
        gnorm1=(ones(nfd), zeros(nfd), ones(nfd)),
        gnorm2=(ones(2 * nfd), zeros(2 * nfd), ones(2 * nfd)),
        gnorm3=(ones(4 * nfd), zeros(4 * nfd), ones(4 * nfd)),
        fc_g1_w=w(keys[3], (4 * nfd, 1024)),     fc_g1_b=zeros(1024),
        fc_g2_w=w(keys[4], (1024, 128)),         fc_g2_b=zeros(128),
        embed=w(keys[5], (26, 128), 1.0),        # num_features_xt + 1 = 26
        # Conv1d weights are stored tap-major: (k, in_c, out_c).
        # (A torch Conv1d weight (out_c, in_c, k) imports via transpose(2,1,0).)
        conv1_w=w(keys[6], (12, 128, 32)),       conv1_b=zeros(32),
        conv2_w=w(keys[7], (12, 32, 32)),        conv2_b=zeros(32),
        conv3_w=w(keys[8], (12, 32, 64)),        conv3_b=zeros(64),
        xtbn1=bn(32), xtbn2=bn(32), xtbn3=bn(64),
        fc1_xt_w=w(keys[9], (80 * 64, 1024)),    fc1_xt_b=zeros(1024),
        fc2_xt_w=w(keys[10], (1024, 128)),       fc2_xt_b=zeros(128),
        fc1_w=w(keys[11], (256, 1024)),          fc1_b=zeros(1024),
        fc2_w=w(keys[12], (1024, 512)),          fc2_b=zeros(512),
        out_w=w(keys[13], (512, 1)),             out_b=zeros(1),
        bn1=bn(1024), bn1t=bn(1024), bn2=bn(1024), bn3=bn(512),
    )


if __name__ == "__main__":
    key = jax.random.PRNGKey(0)
    kp, kx, kt = jax.random.split(key, 3)
    params = init_params(kp)

    # Graph input: 2 graphs of 8 nodes each, 69-dim node features, chain edges.
    num_nodes, num_graphs = 16, 2
    x = jax.random.normal(kx, (num_nodes, 69), dtype=jnp.float32)
    batch = jnp.array([0] * 8 + [1] * 8, dtype=jnp.int32)
    src, dst = [], []
    for g in range(num_graphs):
        base = g * 8
        for i in range(7):
            src += [base + i, base + i + 1]
            dst += [base + i + 1, base + i]
    edge_index = jnp.array([src, dst], dtype=jnp.int32)

    # Protein input: seq length 1000 is required by the hard-coded 80*64
    # flatten (1000 - 3*11 = 967, floor(967/12) = 80 positions, 64 channels).
    seq_len = 1000
    target = jax.random.randint(kt, (2, seq_len), 0, 26, dtype=jnp.int32)

    out = cnnet_forward(params, x, edge_index, batch, num_graphs, target)
    out = jax.block_until_ready(out)
    assert out.shape == (2, 1) and out.dtype == jnp.float32
    print("KERNEL_OK")
</pallas_src>

<mosaic_0001>
module attributes {stable_mosaic.version = 11 : i64} {
  func.func @_gcn_kernel(%arg0: i32, %arg1: memref<16x128xf32, #tpu.memory_space<vmem>>, %arg2: memref<128x128xf32, #tpu.memory_space<vmem>>, %arg3: memref<128x128xf32, #tpu.memory_space<vmem>>, %arg4: memref<1x128xf32, #tpu.memory_space<vmem>>, %arg5: memref<16x128xf32, #tpu.memory_space<vmem>>, %arg6: memref<128x128xf32, #tpu.memory_space<vmem>>) attributes {dimension_semantics = [#tpu.dimension_semantics<arbitrary>], iteration_bounds = array<i64: 1>, scalar_prefetch = 0 : i64, scratch_operands = 1 : i64, tpu.core_type = #tpu.core_type<tc>, window_params = [{pipeline_mode = #tpu.pipeline_mode<synchronous>, transform_indices = @transform_0, window_bounds = array<i64: 16, 128>}, {pipeline_mode = #tpu.pipeline_mode<synchronous>, transform_indices = @transform_1, window_bounds = array<i64: 128, 128>}, {pipeline_mode = #tpu.pipeline_mode<synchronous>, transform_indices = @transform_2, window_bounds = array<i64: 128, 128>}, {pipeline_mode = #tpu.pipeline_mode<synchronous>, transform_indices = @transform_3, window_bounds = array<i64: 1, 128>}, {pipeline_mode = #tpu.pipeline_mode<synchronous>, transform_indices = @transform_4, window_bounds = array<i64: 16, 128>}]} {
    %c0 = arith.constant 0 : index
    %c0_0 = arith.constant 0 : index
    %0 = vector.load %arg2[%c0, %c0_0] : memref<128x128xf32, #tpu.memory_space<vmem>>, vector<128x128xf32>
    %c0_1 = arith.constant 0 : index
    %c0_2 = arith.constant 0 : index
    %1 = vector.load %arg3[%c0_1, %c0_2] : memref<128x128xf32, #tpu.memory_space<vmem>>, vector<128x128xf32>
    %cst = arith.constant dense<0.000000e+00> : vector<128x128xf32>
    %2 = tpu.matmul %0, %1, %cst {dimension_numbers = #tpu.dot_dimension_numbers<[1], [0], [0], [1], [0, 0, 1, 1], [], []>} : vector<128x128xf32>, vector<128x128xf32>, vector<128x128xf32> -> vector<128x128xf32>
    %c0_3 = arith.constant 0 : index
    %c0_4 = arith.constant 0 : index
    %3 = vector.load %arg6[%c0_3, %c0_4] : memref<128x128xf32, #tpu.memory_space<vmem>>, vector<128x128xf32>
    tpu.vector_store %arg6[%c0_3, %c0_4], %2 {strides = array<i32>} : memref<128x128xf32, #tpu.memory_space<vmem>>, vector<128x128xf32>,
    %c0_5 = arith.constant 0 : index
    %c0_6 = arith.constant 0 : index
    %4 = vector.load %arg1[%c0_5, %c0_6] : memref<16x128xf32, #tpu.memory_space<vmem>>, vector<16x128xf32>
    %c0_7 = arith.constant 0 : index
    %c0_8 = arith.constant 0 : index
    %5 = vector.load %arg6[%c0_7, %c0_8] : memref<128x128xf32, #tpu.memory_space<vmem>>, vector<128x128xf32>
    %cst_9 = arith.constant dense<0.000000e+00> : vector<16x128xf32>
    %6 = tpu.matmul %4, %5, %cst_9 {dimension_numbers = #tpu.dot_dimension_numbers<[1], [0], [0], [1], [0, 0, 1, 1], [], []>} : vector<16x128xf32>, vector<128x128xf32>, vector<16x128xf32> -> vector<16x128xf32>
    %c0_10 = arith.constant 0 : index
    %c0_11 = arith.constant 0 : index
    %7 = vector.load %arg4[%c0_10, %c0_11] : memref<1x128xf32, #tpu.memory_space<vmem>>, vector<1x128xf32>
    %8 = vector.broadcast %7 : vector<1x128xf32> to vector<16x128xf32>
    %9 = arith.addf %6, %8 : vector<16x128xf32>
    %c0_12 = arith.constant 0 : index
    %c0_13 = arith.constant 0 : index
    %10 = vector.load %arg5[%c0_12, %c0_13] : memref<16x128xf32, #tpu.memory_space<vmem>>, vector<16x128xf32>
    tpu.vector_store %arg5[%c0_12, %c0_13], %9 {strides = array<i32>} : memref<16x128xf32, #tpu.memory_space<vmem>>, vector<16x128xf32>,
    return
  }
  func.func @transform_0(%arg0: i32) -> (i32, i32) {
    %c0_i32 = arith.constant 0 : i32
    %c0_i32_0 = arith.constant 0 : i32
    %c0_i32_1 = arith.constant 0 : i32
    return %c0_i32, %c0_i32_0 : i32, i32
  }
  func.func @transform_1(%arg0: i32) -> (i32, i32) {
    %c0_i32 = arith.constant 0 : i32
    %c0_i32_0 = arith.constant 0 : i32
    %c0_i32_1 = arith.constant 0 : i32
    return %c0_i32, %c0_i32_0 : i32, i32
  }
  func.func @transform_2(%arg0: i32) -> (i32, i32) {
    %c0_i32 = arith.constant 0 : i32
    %c0_i32_0 = arith.constant 0 : i32
    %c0_i32_1 = arith.constant 0 : i32
    return %c0_i32, %c0_i32_0 : i32, i32
  }
  func.func @transform_3(%arg0: i32) -> (i32, i32) {
    %c0_i32 = arith.constant 0 : i32
    %c0_i32_0 = arith.constant 0 : i32
    %c0_i32_1 = arith.constant 0 : i32
    return %c0_i32, %c0_i32_0 : i32, i32
  }
  func.func @transform_4(%arg0: i32) -> (i32, i32) {
    %c0_i32 = arith.constant 0 : i32
    %c0_i32_0 = arith.constant 0 : i32
    %c0_i32_1 = arith.constant 0 : i32
    return %c0_i32, %c0_i32_0 : i32, i32
  }
}

</mosaic_0001>

<bundles_post_ra>
// kernel: tpu_custom_call.1
= control target key start
LH: loop header
LB: loop body
LE: loop exit
PB: predicated region body
PF: predicated region fallthrough
CT: control target
= control target key end

     0   :  { %9 = vsyncpa [#allocation4], 0  ;;  %s779_s0 = inlined_call_operand.hbm [shape: f32[16,128], index: 0, kind: input, shape index: {}]   ;;  %s780_s1 = inlined_call_operand.hbm [shape: f32[128,128], index: 1, kind: input, shape index: {}]   ;;  %s781_s2 = inlined_call_operand.hbm [shape: f32[128,128], index: 2, kind: input, shape index: {}]   ;;  %s782_s3 = inlined_call_operand.vmem [shape: f32[1,128], index: 3, kind: input, shape index: {}]   ;;  %s783_s4 = inlined_call_operand.hbm [shape: f32[16,128], index: 4, kind: output, shape index: {}]  }
   0x1   :  { %10 = vsyncpa [#allocation7], 0 }
   0x2   :  { %11 = vsyncpa [#allocation5], 0  ;;  %s678_s15 = smov [#allocation6]   ;;  %s679_s17 = smov [#allocation3]  }
   0x3   :  { %s29_s16 = sshll.u32 %s678_s15, 4  ;;  %s17_s18 = sshll.u32 %s679_s17, 4  ;;  %s30_s16 = int_to_ptr.vmem [resolvable:$true] %s29_s16  ;;  %s709_s18 = int_to_ptr.vmem [resolvable:$true] %s17_s18 }
   0x4   :  { %s584_s21 = scalar_lea.hbm %s780_s1, 2048 }
   0x5   :  { %p585_p0 = scmp.ne.s32.totalorder %s780_s1, %s584_s21  ;;  %p588_p1 = scmp.lt.u32.totalorder %s584_s21, %s780_s1 }
   0x7   :  { %p590_p2 = pnand %p588_p1, %p585_p0 }
   0x9   :  { %593 = shalt.err (!%p590_p2)
}
   0xa   :  { %s594_s26 = scalar_lea.vmem %s30_s16, 2048  ;;  %p599_p4 = scmp.lt.s32.totalorder %s30_s16, %s30_s16 }
   0xb   :  { %p595_p3 = scmp.ne.s32.totalorder %s30_s16, %s594_s26  ;;  %p600_p5 = scmp.lt.s32.totalorder %s594_s26, %s594_s26 }
   0xd   :  { %p601_p6 = por %p600_p5, %p599_p4 }
   0xf   :  { %p602_p7 = pnand %p601_p6, %p595_p3 }
  0x11   :  { %605 = shalt.err (!%p602_p7)
}
  0x12   :  { %s680_s27 = smov 128   ;;  %s681_s28 = smov 8  }
  0x13   :  { %35 = dma.hbm_to_vmem [thread:$0]  %s780_s1, 2048, %s30_s16, [#allocation7], %s680_s27, %s680_s27, %s681_s28  }
  0x14   :  { %s606_s7 = scalar_lea.hbm %s779_s0, 256 }
  0x15   :  { %p607_p8 = scmp.ne.s32.totalorder %s779_s0, %s606_s7  ;;  %p610_p9 = scmp.lt.u32.totalorder %s606_s7, %s779_s0 }
  0x17   :  { %p612_p10 = pnand %p610_p9, %p607_p8 }
  0x19   :  { %615 = shalt.err (!%p612_p10)
}
  0x1a   :  { %s616_s12 = scalar_lea.vmem %s709_s18, 256  ;;  %p621_p12 = scmp.lt.s32.totalorder %s709_s18, %s709_s18 }
  0x1b   :  { %p617_p11 = scmp.ne.s32.totalorder %s709_s18, %s616_s12  ;;  %p622_p13 = scmp.lt.s32.totalorder %s616_s12, %s616_s12 }
  0x1d   :  { %p623_p0 = por %p622_p13, %p621_p12 }
  0x1f   :  { %p624_p1 = pnand %p623_p0, %p617_p11 }
  0x21   :  { %627 = shalt.err (!%p624_p1)
}
  0x22   :  { %23 = dma.hbm_to_vmem [thread:$0]  %s779_s0, 256, %s709_s18, [#allocation4], %s680_s27, %s680_s27, %s681_s28  }
  0x23   :  { %s682_s14 = smov [#allocation8]   ;;  %s628_s19 = scalar_lea.hbm %s781_s2, 2048 }
  0x24   :  { %s41_s15 = sshll.u32 %s682_s14, 4  ;;  %p629_p2 = scmp.ne.s32.totalorder %s781_s2, %s628_s19  ;;  %s42_s15 = int_to_ptr.vmem [resolvable:$true] %s41_s15 }
  0x25   :  { %p632_p3 = scmp.lt.u32.totalorder %s628_s19, %s781_s2 }
  0x27   :  { %p634_p4 = pnand %p632_p3, %p629_p2 }
  0x29   :  { %637 = shalt.err (!%p634_p4)
}
  0x2a   :  { %s638_s24 = scalar_lea.vmem %s42_s15, 2048  ;;  %p643_p6 = scmp.lt.s32.totalorder %s42_s15, %s42_s15 }
  0x2b   :  { %p639_p5 = scmp.ne.s32.totalorder %s42_s15, %s638_s24  ;;  %p644_p7 = scmp.lt.s32.totalorder %s638_s24, %s638_s24 }
  0x2d   :  { %p645_p8 = por %p644_p7, %p643_p6 }
  0x2f   :  { %p646_p9 = pnand %p645_p8, %p639_p5 }
  0x31   :  { %649 = shalt.err (!%p646_p9)
}
  0x32   :  { %47 = dma.hbm_to_vmem [thread:$0]  %s781_s2, 2048, %s42_s15, [#allocation7], %s680_s27, %s680_s27, %s681_s28  }
  0x33   :  { %672 = dma.done.wait [#allocation4], 256  }
  0x34   :  { %673 = vsyncadd [#allocation4], 4294967040 }
  0x35   :  { %674 = dma.done.wait [#allocation7], 4096  }
  0x36   :  { %675 = vsyncadd [#allocation7], 4294963200  ;;  %v75_v0 = vld [vmem:[#allocation8] sm:$0xff]  ;;  %v76_v1 = vld [vmem:[#allocation8 + $0x8] sm:$0xff]  ;;  %s683_s26 = smov [#allocation9]  }
  0x37   :  { %v77_v2 = vld [vmem:[#allocation8 + $0x10] sm:$0xff]  ;;  %v514_v3 = vpack.c.bf16 %v76_v1, %v75_v0  ;;  %v78_v4 = vld [vmem:[#allocation8 + $0x18] sm:$0xff]  ;;  %v79_v6 = vld [vmem:[#allocation8 + $0x20] sm:$0xff]  ;;  %s359_s29 = sshll.u32 %s683_s26, 4  ;;  %s360_s29 = int_to_ptr.vmem [resolvable:$true] %s359_s29 }
  0x38   :  { %v518_v5 = vpack.c.bf16 %v78_v4, %v77_v2  ;;  %v80_v7 = vld [vmem:[#allocation8 + $0x28] sm:$0xff]  ;;  %v59_v9 = vld [vmem:[#allocation6] sm:$0xff]  ;;  %v81_v10 = vld [vmem:[#allocation8 + $0x30] sm:$0xff]  ;;  %s650_s30 = scalar_lea.vmem %s360_s29, 256  ;;  %p655_p11 = scmp.lt.s32.totalorder %s360_s29, %s360_s29 }
  0x39   :  { %515 = vmatprep.subr.bf16.mxu0 %v514_v3  ;;  %v522_v8 = vpack.c.bf16 %v80_v7, %v79_v6  ;;  %v82_v11 = vld [vmem:[#allocation8 + $0x38] sm:$0xff]  ;;  %455 = vmatprep.mubr.f32.mxu0 %v59_v9  ;;  %v83_v13 = vld [vmem:[#allocation8 + $0x40] sm:$0xff]  ;;  %v84_v14 = vld [vmem:[#allocation8 + $0x48] sm:$0xff]  ;;  %p651_p10 = scmp.ne.s32.totalorder %s360_s29, %s650_s30  ;;  %p656_p12 = scmp.lt.s32.totalorder %s650_s30, %s650_s30 }
  0x3a   :  { %517 = vmatpush3.bf16.msra.mxu0 %v514_v3  ;;  %v526_v12 = vpack.c.bf16 %v82_v11, %v81_v10  ;;  %v530_v15 = vpack.c.bf16 %v84_v14, %v83_v13  ;;  %v85_v16 = vld [vmem:[#allocation8 + $0x50] sm:$0xff]  ;;  %v86_v17 = vld [vmem:[#allocation8 + $0x58] sm:$0xff]  ;;  %v87_v19 = vld [vmem:[#allocation8 + $0x60] sm:$0xff] }
  0x3b   :  { %519 = vmatprep.subr.bf16.mxu0 %v518_v5  ;;  %v534_v18 = vpack.c.bf16 %v86_v17, %v85_v16  ;;  %v88_v20 = vld [vmem:[#allocation8 + $0x68] sm:$0xff]  ;;  %v89_v22 = vld [vmem:[#allocation8 + $0x70] sm:$0xff]  ;;  %v90_v23 = vld [vmem:[#allocation8 + $0x78] sm:$0xff]  ;;  %p657_p13 = por %p656_p12, %p655_p11 }
  0x3c   :  { %v538_v21 = vpack.c.bf16 %v88_v20, %v87_v19  ;;  %v542_v24 = vpack.c.bf16 %v90_v23, %v89_v22  ;;  %v60_v25 = vld [vmem:[#allocation6 + $0x8] sm:$0xff]  ;;  %v61_v26 = vld [vmem:[#allocation6 + $0x10] sm:$0xff]  ;;  %v62_v27 = vld [vmem:[#allocation6 + $0x18] sm:$0xff] }
  0x3d   :  { %v63_v28 = vld [vmem:[#allocation6 + $0x20] sm:$0xff]  ;;  %v64_v29 = vld [vmem:[#allocation6 + $0x28] sm:$0xff]  ;;  %v65_v30 = vld [vmem:[#allocation6 + $0x30] sm:$0xff]  ;;  %p658_p0 = pnand %p657_p13, %p651_p10 }
  0x3e   :  { %521 = vmatpush3.bf16.msra.mxu0 %v518_v5  ;;  %v66_v31 = vld [vmem:[#allocation6 + $0x38] sm:$0xff]  ;;  %v67_v32 = vld [vmem:[#allocation6 + $0x40] sm:$0xff]  ;;  %v68_v33 = vld [vmem:[#allocation6 + $0x48] sm:$0xff] }
  0x3f   :  { %523 = vmatprep.subr.bf16.mxu0 %v522_v8  ;;  %v69_v34 = vld [vmem:[#allocation6 + $0x50] sm:$0xff]  ;;  %v70_v35 = vld [vmem:[#allocation6 + $0x58] sm:$0xff]  ;;  %v71_v36 = vld [vmem:[#allocation6 + $0x60] sm:$0xff] }
  0x40   :  { %v72_v37 = vld [vmem:[#allocation6 + $0x68] sm:$0xff]  ;;  %v73_v38 = vld [vmem:[#allocation6 + $0x70] sm:$0xff]  ;;  %v74_v39 = vld [vmem:[#allocation6 + $0x78] sm:$0xff] }
  0x41   :  { %v252_v40 = vld [vmem:[#allocation3] sm:$0xff]  ;;  %v253_v1 = vld [vmem:[#allocation3 + $0x8] sm:$0xff] }
  0x42   :  { %525 = vmatpush3.bf16.msra.mxu0 %v522_v8  ;;  %511 = vmatprep.mubr.f32.mxu1 %v252_v40  ;;  %v372_v2 = vld [vmem:[%s782_s3] ss:$0 sm:$0xff] }
  0x43   :  { %527 = vmatprep.subr.bf16.mxu0 %v526_v12 }
  0x46   :  { %529 = vmatpush3.bf16.msra.mxu0 %v526_v12 }
  0x47   :  { %531 = vmatprep.subr.bf16.mxu0 %v530_v15 }
  0x4a   :  { %533 = vmatpush3.bf16.msra.mxu0 %v530_v15 }
  0x4b   :  { %535 = vmatprep.subr.bf16.mxu0 %v534_v18 }
  0x4e   :  { %537 = vmatpush3.bf16.msra.mxu0 %v534_v18 }
  0x4f   :  { %539 = vmatprep.subr.bf16.mxu0 %v538_v21 }
  0x52   :  { %541 = vmatpush3.bf16.msra.mxu0 %v538_v21 }
  0x53   :  { %543 = vmatprep.subr.bf16.mxu0 %v542_v24 }
  0x56   :  { %545 = vmatpush3.bf16.msra.mxu0 %v542_v24 }
  0x59   :  { %456 = vmatmul.mubr.f32.vlgmr.msra.gmra.mrb[0].mxu0 %v60_v25 }
  0x5a   :  { %458 = vmatprep.mubr.f32.mxu0 %v61_v26 }
  0x5d   :  { %459 = vmatmul.mubr.f32.gmra.mrb[2].mxu0 %v62_v27 }
  0x5e   :  { %461 = vmatprep.mubr.f32.mxu0 %v63_v28 }
  0x61   :  { %462 = vmatmul.mubr.f32.gmra.mrb[4].mxu0 %v64_v29 }
  0x62   :  { %464 = vmatprep.mubr.f32.mxu0 %v65_v30 }
  0x65   :  { %465 = vmatmul.mubr.f32.gmra.mrb[6].mxu0 %v66_v31 }
  0x66   :  { %467 = vmatprep.mubr.f32.mxu0 %v67_v32 }
  0x69   :  { %468 = vmatmul.mubr.f32.gmra.mrb[8].mxu0 %v68_v33 }
  0x6a   :  { %470 = vmatprep.mubr.f32.mxu0 %v69_v34 }
  0x6d   :  { %471 = vmatmul.mubr.f32.gmra.mrb[10].mxu0 %v70_v35 }
  0x6e   :  { %473 = vmatprep.mubr.f32.mxu0 %v71_v36 }
  0x71   :  { %474 = vmatmul.mubr.f32.gmra.mrb[12].mxu0 %v72_v37 }
  0x72   :  { %476 = vmatprep.mubr.f32.mxu0 %v73_v38 }
  0x75   :  { %477 = vmatmul.mubr.f32.gmra.mrb[14].mxu0 %v74_v39 }
 0x12c   :  { %v457_v41 = vpop.f32.mrb[0].mxu0 }
 0x12d   :  { %v157_v42 = vpop.f32.mrb[1].mxu0 }
 0x12e   :  { %v546_v43 = vpack.c.bf16 %v457_v41, %v157_v42 }
 0x130   :  { %v460_v44 = vpop.f32.mrb[2].mxu0  ;;  %547 = vmatprep.subr.bf16.mxu1 %v546_v43 }
 0x131   :  { %v167_v45 = vpop.f32.mrb[3].mxu0  ;;  %549 = vmatpush3.bf16.msra.mxu1 %v546_v43 }
 0x132   :  { %v550_v46 = vpack.c.bf16 %v460_v44, %v167_v45 }
 0x134   :  { %v463_v47 = vpop.f32.mrb[4].mxu0  ;;  %551 = vmatprep.subr.bf16.mxu1 %v550_v46 }
 0x135   :  { %v177_v48 = vpop.f32.mrb[5].mxu0  ;;  %553 = vmatpush3.bf16.msra.mxu1 %v550_v46 }
 0x136   :  { %v554_v49 = vpack.c.bf16 %v463_v47, %v177_v48 }
 0x138   :  { %v466_v50 = vpop.f32.mrb[6].mxu0  ;;  %555 = vmatprep.subr.bf16.mxu1 %v554_v49 }
 0x139   :  { %v187_v51 = vpop.f32.mrb[7].mxu0  ;;  %557 = vmatpush3.bf16.msra.mxu1 %v554_v49 }
 0x13a   :  { %v558_v52 = vpack.c.bf16 %v466_v50, %v187_v51 }
 0x13c   :  { %v469_v53 = vpop.f32.mrb[8].mxu0  ;;  %559 = vmatprep.subr.bf16.mxu1 %v558_v52 }
 0x13d   :  { %v197_v54 = vpop.f32.mrb[9].mxu0  ;;  %561 = vmatpush3.bf16.msra.mxu1 %v558_v52 }
 0x13e   :  { %v562_v55 = vpack.c.bf16 %v469_v53, %v197_v54 }
 0x140   :  { %v472_v56 = vpop.f32.mrb[10].mxu0  ;;  %563 = vmatprep.subr.bf16.mxu1 %v562_v55 }
 0x141   :  { %v207_v57 = vpop.f32.mrb[11].mxu0  ;;  %565 = vmatpush3.bf16.msra.mxu1 %v562_v55 }
 0x142   :  { %v566_v58 = vpack.c.bf16 %v472_v56, %v207_v57 }
 0x144   :  { %v475_v59 = vpop.f32.mrb[12].mxu0  ;;  %567 = vmatprep.subr.bf16.mxu1 %v566_v58 }
 0x145   :  { %v217_v60 = vpop.f32.mrb[13].mxu0  ;;  %569 = vmatpush3.bf16.msra.mxu1 %v566_v58 }
 0x146   :  { %v570_v61 = vpack.c.bf16 %v475_v59, %v217_v60 }
 0x148   :  { %v478_v62 = vpop.f32.mrb[14].mxu0  ;;  %571 = vmatprep.subr.bf16.mxu1 %v570_v61 }
 0x149   :  { %v227_v63 = vpop.f32.mrb[15].mxu0  ;;  %573 = vmatpush3.bf16.msra.mxu1 %v570_v61 }
 0x14a   :  { %v574_v0 = vpack.c.bf16 %v478_v62, %v227_v63 }
 0x14c   :  { %575 = vmatprep.subr.bf16.mxu1 %v574_v0 }
 0x14d   :  { %577 = vmatpush3.bf16.msra.mxu1 %v574_v0 }
 0x150   :  { %512 = vmatmul.mubr.f32.vlgmr.msra.gmra.mrb[0].mxu1 %v253_v1 }
 0x223   :  { %v513_v3 = vpop.f32.mrb[0].mxu1 }
 0x224   :  { %v349_v4 = vadd.f32 %v513_v3, %v372_v2  ;;  %v343_v5 = vpop.f32.mrb[1].mxu1 }
 0x225   :  { %v344_v6 = vadd.f32 %v372_v2, %v343_v5 }
 0x226   :  { %353 = vst [vmem:[#allocation9 + $0x8] sm:$0xff] %v349_v4 }
 0x227   :  { %352 = vst [vmem:[#allocation9] sm:$0xff] %v344_v6 }
 0x228   :  { %661 = shalt.err (!%p658_p0)
}
 0x229   :  { %s662_s3 = scalar_lea.hbm %s783_s4, 256 }
 0x22a   :  { %p663_p1 = scmp.ne.s32.totalorder %s783_s4, %s662_s3  ;;  %p666_p2 = scmp.lt.u32.totalorder %s662_s3, %s783_s4 }
 0x22c   :  { %p668_p3 = pnand %p666_p2, %p663_p1 }
 0x22e   :  { %671 = shalt.err (!%p668_p3)
}
 0x22f   :  { %365 = dma.vmem_to_hbm [thread:$0]  %s360_s29, 256, %s783_s4, [#allocation5], %s680_s27, %s680_s27, %s681_s28  }
 0x230   :  { %676 = dma.done.wait [#allocation5], 256  }
 0x231   :  { %677 = vsyncadd [#allocation5], 4294967040 }
 0x232   :  { %369 = vsyncpa [#allocation4], 1 }
 0x233   :  { %370 = vsyncpa [#allocation7], 1 }
 0x234   :  { %371 = vsyncpa [#allocation5], 1 }

</bundles_post_ra>
